<compile_context>
chip_gen: v6e
topology: v6e:2x2x1
jax: 0.10.0
libtpu: 0.0.40
codegen_flags: <defaults>
</compile_context>

<pallas_src>
import functools

import jax
import jax.numpy as jnp
import numpy as np
from jax.experimental import pallas as pl
from jax.experimental.pallas import tpu as pltpu


def _lane_group_max(x, groups, width):
    """Max over `groups` contiguous lane-groups of `width` columns.

    x: (rows, groups*width) -> (rows, width).  Elementwise VPU maxima on
    static lane slices (log2(groups) folds when groups is a power of two).
    """
    tail = None
    while groups > 1:
        if groups % 2 == 1:
            t = x[:, (groups - 1) * width: groups * width]
            tail = t if tail is None else jnp.maximum(tail, t)
            groups -= 1
        half = groups // 2
        x = jnp.maximum(x[:, :half * width], x[:, half * width: groups * width])
        groups = half
    if tail is not None:
        x = jnp.maximum(x, tail)
    return x


def _miml_kernel(x_ref, w1_ref, c1_ref, w2_ref, c2_ref, out_ref, sub_ref,
                 *, M, K, L):
    """One batch tile (TB batch elements = TB*M instances) per grid step.

    x_ref  : (TB, M*F)      lane-packed bags; column m*F + f
    w1_ref : (M*F, M*FC)    block-diagonal fc weight, BN1 scale folded in
    c1_ref : (1, M*FC)      folded BN1 bias (includes conv bias); col m*FC + c
    w2_ref : (M*FC, K*M*L)  block-structured sub_concept weight, BN2 scale
                            folded in; output column k*M*L + m*L + l
    c2_ref : (1, K*M*L)     folded BN2 bias in the same column order
    out_ref: (TB, L)        log-softmax
    sub_ref: (TB, M*L)      sub_concept_pooling slab; column m*L + l
    """
    ML = M * L

    # fc -> bn_1 -> ReLU: one lane-dense matmul over all M instances at once
    # (1x1 conv == matmul over channels; BN scale pre-folded into the weight).
    x = x_ref[...].astype(w1_ref.dtype)
    h1 = jnp.maximum(
        jnp.dot(x, w1_ref[...], preferred_element_type=jnp.float32)
        + c1_ref[...], 0.0)                                   # (TB, M*FC) f32

    # sub_concept_layer -> bn_2 -> ReLU (output columns K-major, then M, L).
    h2 = jnp.maximum(
        jnp.dot(h1.astype(w2_ref.dtype), w2_ref[...],
                preferred_element_type=jnp.float32)
        + c2_ref[...], 0.0)                                   # (TB, K*M*L) f32

    # Sub-concept max-pool over K: K-1 elementwise maxima over full (TB, M*L)
    # 128-lane slices (pure VPU, no lane relayout).  Result column m*L + l.
    sub = h2[:, 0:ML]
    for k in range(1, K):
        sub = jnp.maximum(sub, h2[:, k * ML:(k + 1) * ML])    # (TB, M*L)
    sub_ref[...] = sub                                        # lane-dense store

    # Basis pooling: max over the M instances = log2(M) lane-slice folds.
    logits = _lane_group_max(sub, M, L)                       # (TB, L)

    # LogSoftmax over L (f32).
    mx = jnp.max(logits, axis=-1, keepdims=True)
    e = jnp.exp(logits - mx)
    lse = jnp.log(jnp.sum(e, axis=-1, keepdims=True)) + mx
    out_ref[...] = logits - lse


def miml_forward(x, w1, s1, c1, w2, s2, c2, *, K, L, block_b=None,
                 compute_dtype=jnp.bfloat16):
    """x: (B, M, F).  Returns (log_softmax (B, L), sub_pool (B, 1, M, L)).

    w1 (F, FC), w2 (FC, K*L): 1x1-conv weights (transposed; w2 columns in the
    PyTorch channel order c = l*K + k).  s1/c1, s2/c2: inference-mode folded
    BatchNorm scale/bias (conv bias already inside c*).  compute_dtype is the
    dtype fed to the MXU (bf16 by default; accumulation, bias adds, pooling
    and softmax stay f32).  Passing x already in bf16 halves the dominant
    HBM stream.
    """
    B, M, F = x.shape
    FC = w1.shape[1]
    KL = w2.shape[1]
    assert KL == K * L

    f32 = jnp.float32
    s1 = jnp.asarray(s1, f32).reshape(FC)
    c1 = jnp.asarray(c1, f32).reshape(FC)
    s2 = jnp.asarray(s2, f32).reshape(KL)
    c2 = jnp.asarray(c2, f32).reshape(KL)

    # Fold BN scales into the weights (exact: a per-output-column scale
    # commutes with the matmul), permute layer-2 columns from PyTorch order
    # c = l*K + k to k-major, and expand both layers into block-diagonal
    # weights so the whole bag of M instances is one lane-dense matmul:
    #   W1bd[m*F + f,  m*FC + c]         = w1[f, c]       * s1[c]
    #   W2bd[m*FC + c, k*M*L + m*L + l]  = w2[c, l*K + k] * s2[l*K + k]
    eye = jnp.eye(M, dtype=f32)
    w1f = jnp.asarray(w1, f32) * s1[None, :]
    w1bd = jnp.einsum('fc,mn->mfnc', w1f, eye).reshape(M * F, M * FC)
    c1bd = jnp.tile(c1, M).reshape(1, M * FC)

    w2f = jnp.asarray(w2, f32) * s2[None, :]
    w2p = w2f.reshape(FC, L, K).transpose(0, 2, 1)            # [c, k, l]
    w2bd = jnp.einsum('ckl,mn->mcknl', w2p, eye).reshape(M * FC, K * M * L)
    c2p = c2.reshape(L, K).T                                  # [k, l]
    c2bd = jnp.broadcast_to(c2p[:, None, :], (K, M, L)).reshape(1, K * M * L)

    w1bd = w1bd.astype(compute_dtype)
    w2bd = w2bd.astype(compute_dtype)

    # Lane-dense input: (B, M*F) -- contiguous reshape, no HBM copy.
    xf = jnp.asarray(x).reshape(B, M * F)

    # Batch tile: >= 2 parallel grid steps once B >= 16 (both v7x TensorCores
    # via the "parallel" axis), growing to 512-row tiles for large B so the
    # ~0.35us per-grid-step overhead is amortized.  Per-tile VMEM at TB=512 is
    # only a few MiB -> fits v5e's 16 MiB default scoped limit and v7x's
    # 64 MiB VMEM, no vmem_limit override needed.
    if block_b is None:
        block_b = min(512, max(8, 8 * pl.cdiv(B, 16)))
    TB = min(B, block_b)
    n_blocks = pl.cdiv(B, TB)
    if n_blocks > 1:
        TB = max(8, (TB // 8) * 8)    # 2nd-minor block dim multiple of 8
        n_blocks = pl.cdiv(B, TB)
    # No host-side tail padding: a ragged last block (if any) is computed on
    # garbage rows and its out-of-range output rows are dropped on writeback.

    kernel = functools.partial(_miml_kernel, M=M, K=K, L=L)

    out, sub_flat = pl.pallas_call(
        kernel,
        out_shape=(
            jax.ShapeDtypeStruct((B, L), f32),        # minor dim == full dim L
            jax.ShapeDtypeStruct((B, M * L), f32),    # 128-lane dense slab
        ),
        grid_spec=pltpu.PrefetchScalarGridSpec(
            num_scalar_prefetch=0,
            grid=(n_blocks,),
            in_specs=[
                pl.BlockSpec((TB, M * F), lambda b: (b, 0)),
                pl.BlockSpec((M * F, M * FC), lambda b: (0, 0)),
                pl.BlockSpec((1, M * FC), lambda b: (0, 0)),
                pl.BlockSpec((M * FC, K * M * L), lambda b: (0, 0)),
                pl.BlockSpec((1, K * M * L), lambda b: (0, 0)),
            ],
            out_specs=[
                pl.BlockSpec((TB, L), lambda b: (b, 0)),
                pl.BlockSpec((TB, M * L), lambda b: (b, 0)),
            ],
        ),
        compiler_params=pltpu.CompilerParams(
            dimension_semantics=("parallel",)),
    )(xf, w1bd, c1bd, w2bd, c2bd)

    sub_pool = sub_flat.reshape(B, 1, M, L)                   # (B, 1, M, L)
    return out, sub_pool


def miml_reference(x, w1, s1, c1, w2, s2, c2, *, K, L):
    """Plain-JAX reference used for correctness check."""
    B, M, F = x.shape
    h1 = jnp.maximum(jnp.einsum('bmf,fc->bmc', x, w1) * s1 + c1, 0.0)
    h2 = jnp.maximum(jnp.einsum('bmc,ck->bmk', h1, w2) * s2 + c2, 0.0)
    cube = h2.reshape(B, M, L, K)                 # channel c = l*K + k
    sub = cube.max(axis=-1)                       # (B, M, L)
    sub_pool = sub[:, None, :, :]                 # (B, 1, M, L)
    logits = sub.max(axis=1)                      # (B, L)
    out = jax.nn.log_softmax(logits, axis=-1)
    return out, sub_pool


if __name__ == "__main__":
    # args.F=4, args.fc_dimensions=32, args.K=4, args.L=8, args.M=16, batch=2
    B, F, FC, K, L, M = 2, 4, 32, 4, 8, 16
    eps = 1e-5

    key = jax.random.PRNGKey(0)
    ks = jax.random.split(key, 12)

    # input bag of M basis vectors of dim F (channels-last layout (B, M, F);
    # the PyTorch module takes the same data as (B, F, M))
    x = jax.random.normal(ks[0], (B, M, F), jnp.float32)

    # Conv2d(F, FC, 1) parameters: PyTorch weight (FC, F, 1, 1) -> here (F, FC)
    w1 = jax.random.normal(ks[1], (F, FC), jnp.float32) * 0.3
    b1 = jax.random.normal(ks[2], (FC,), jnp.float32) * 0.1
    # BatchNorm2d(FC) params / running stats (inference mode)
    g1 = 1.0 + 0.1 * jax.random.normal(ks[3], (FC,), jnp.float32)
    be1 = 0.1 * jax.random.normal(ks[4], (FC,), jnp.float32)
    rm1 = 0.05 * jax.random.normal(ks[5], (FC,), jnp.float32)
    rv1 = 1.0 + 0.1 * jnp.abs(jax.random.normal(ks[6], (FC,), jnp.float32))

    # Conv2d(FC, K*L, 1) parameters
    w2 = jax.random.normal(ks[7], (FC, K * L), jnp.float32) * 0.2
    b2 = jax.random.normal(ks[8], (K * L,), jnp.float32) * 0.1
    # BatchNorm2d(K*L)
    g2 = 1.0 + 0.1 * jax.random.normal(ks[9], (K * L,), jnp.float32)
    be2 = 0.1 * jax.random.normal(ks[10], (K * L,), jnp.float32)
    rm2 = 0.05 * jax.random.normal(ks[11], (K * L,), jnp.float32)
    rv2 = jnp.ones((K * L,), jnp.float32)

    # TODO(synk): BatchNorm is folded in inference mode (running stats);
    # training-mode batch statistics are not computed.
    s1 = (g1 / jnp.sqrt(rv1 + eps)).reshape(1, FC)
    c1 = ((b1 - rm1) * s1[0] + be1).reshape(1, FC)
    s2 = (g2 / jnp.sqrt(rv2 + eps)).reshape(1, K * L)
    c2 = ((b2 - rm2) * s2[0] + be2).reshape(1, K * L)

    out_ref, sub_ref = miml_reference(x, w1, s1, c1, w2, s2, c2, K=K, L=L)

    # f32 compute path: exact check against the plain-JAX reference.
    out32, sub32 = miml_forward(x, w1, s1, c1, w2, s2, c2, K=K, L=L,
                                compute_dtype=jnp.float32)
    out32 = jax.block_until_ready(out32)
    sub32 = jax.block_until_ready(sub32)
    np.testing.assert_allclose(np.asarray(out32), np.asarray(out_ref),
                               rtol=1e-5, atol=1e-5)
    np.testing.assert_allclose(np.asarray(sub32), np.asarray(sub_ref),
                               rtol=1e-5, atol=1e-5)

    # Default (fast) bf16 MXU path: looser tolerance (f32 accum/softmax kept).
    out16, sub16 = miml_forward(x, w1, s1, c1, w2, s2, c2, K=K, L=L)
    out16 = jax.block_until_ready(out16)
    sub16 = jax.block_until_ready(sub16)
    np.testing.assert_allclose(np.asarray(out16), np.asarray(out_ref),
                               rtol=1e-1, atol=1e-1)
    np.testing.assert_allclose(np.asarray(sub16), np.asarray(sub_ref),
                               rtol=1e-1, atol=1e-1)

    assert out16.shape == (B, L) and sub16.shape == (B, 1, M, L)

    print("KERNEL_OK")
</pallas_src>

<mosaic_0001>
module attributes {stable_mosaic.version = 11 : i64} {
  func.func @_miml_kernel(%arg0: i32, %arg1: memref<2x64xf32, #tpu.memory_space<vmem>>, %arg2: memref<64x512xf32, #tpu.memory_space<vmem>>, %arg3: memref<1x512xf32, #tpu.memory_space<vmem>>, %arg4: memref<512x512xf32, #tpu.memory_space<vmem>>, %arg5: memref<1x512xf32, #tpu.memory_space<vmem>>, %arg6: memref<2x8xf32, #tpu.memory_space<vmem>>, %arg7: memref<2x128xf32, #tpu.memory_space<vmem>>) attributes {dimension_semantics = [#tpu.dimension_semantics<parallel>], iteration_bounds = array<i64: 1>, scalar_prefetch = 0 : i64, scratch_operands = 0 : i64, tpu.core_type = #tpu.core_type<tc>, window_params = [{transform_indices = @transform_0, window_bounds = array<i64: 2, 64>}, {pipeline_mode = #tpu.pipeline_mode<synchronous>, transform_indices = @transform_1, window_bounds = array<i64: 64, 512>}, {pipeline_mode = #tpu.pipeline_mode<synchronous>, transform_indices = @transform_2, window_bounds = array<i64: 1, 512>}, {pipeline_mode = #tpu.pipeline_mode<synchronous>, transform_indices = @transform_3, window_bounds = array<i64: 512, 512>}, {pipeline_mode = #tpu.pipeline_mode<synchronous>, transform_indices = @transform_4, window_bounds = array<i64: 1, 512>}, {transform_indices = @transform_5, window_bounds = array<i64: 2, 8>}, {transform_indices = @transform_6, window_bounds = array<i64: 2, 128>}]} {
    %c0 = arith.constant 0 : index
    %c0_0 = arith.constant 0 : index
    %0 = vector.load %arg1[%c0, %c0_0] : memref<2x64xf32, #tpu.memory_space<vmem>>, vector<2x64xf32>
    %c0_1 = arith.constant 0 : index
    %c0_2 = arith.constant 0 : index
    %1 = vector.load %arg2[%c0_1, %c0_2] : memref<64x512xf32, #tpu.memory_space<vmem>>, vector<64x512xf32>
    %cst = arith.constant dense<0.000000e+00> : vector<2x512xf32>
    %2 = tpu.matmul %0, %1, %cst {dimension_numbers = #tpu.dot_dimension_numbers<[1], [0], [0], [1], [0, 0, 1, 1], [], []>} : vector<2x64xf32>, vector<64x512xf32>, vector<2x512xf32> -> vector<2x512xf32>
    %c0_3 = arith.constant 0 : index
    %c0_4 = arith.constant 0 : index
    %3 = vector.load %arg3[%c0_3, %c0_4] : memref<1x512xf32, #tpu.memory_space<vmem>>, vector<1x512xf32>
    %4 = vector.broadcast %3 : vector<1x512xf32> to vector<2x512xf32>
    %5 = arith.addf %2, %4 : vector<2x512xf32>
    %cst_5 = arith.constant 0.000000e+00 : f32
    %6 = vector.broadcast %cst_5 : f32 to vector<2x512xf32>
    %7 = arith.maximumf %5, %6 : vector<2x512xf32>
    %c0_6 = arith.constant 0 : index
    %c0_7 = arith.constant 0 : index
    %8 = vector.load %arg4[%c0_6, %c0_7] : memref<512x512xf32, #tpu.memory_space<vmem>>, vector<512x512xf32>
    %cst_8 = arith.constant dense<0.000000e+00> : vector<2x512xf32>
    %9 = tpu.matmul %7, %8, %cst_8 {dimension_numbers = #tpu.dot_dimension_numbers<[1], [0], [0], [1], [0, 0, 1, 1], [], []>} : vector<2x512xf32>, vector<512x512xf32>, vector<2x512xf32> -> vector<2x512xf32>
    %c0_9 = arith.constant 0 : index
    %c0_10 = arith.constant 0 : index
    %10 = vector.load %arg5[%c0_9, %c0_10] : memref<1x512xf32, #tpu.memory_space<vmem>>, vector<1x512xf32>
    %11 = vector.broadcast %10 : vector<1x512xf32> to vector<2x512xf32>
    %12 = arith.addf %9, %11 : vector<2x512xf32>
    %cst_11 = arith.constant 0.000000e+00 : f32
    %13 = vector.broadcast %cst_11 : f32 to vector<2x512xf32>
    %14 = arith.maximumf %12, %13 : vector<2x512xf32>
    %15 = vector.extract_strided_slice %14 {offsets = [0, 0], sizes = [2, 128], strides = [1, 1]} : vector<2x512xf32> to vector<2x128xf32>
    %16 = vector.extract_strided_slice %14 {offsets = [0, 128], sizes = [2, 128], strides = [1, 1]} : vector<2x512xf32> to vector<2x128xf32>
    %17 = arith.maximumf %15, %16 : vector<2x128xf32>
    %18 = vector.extract_strided_slice %14 {offsets = [0, 256], sizes = [2, 128], strides = [1, 1]} : vector<2x512xf32> to vector<2x128xf32>
    %19 = arith.maximumf %17, %18 : vector<2x128xf32>
    %20 = vector.extract_strided_slice %14 {offsets = [0, 384], sizes = [2, 128], strides = [1, 1]} : vector<2x512xf32> to vector<2x128xf32>
    %21 = arith.maximumf %19, %20 : vector<2x128xf32>
    %c0_12 = arith.constant 0 : index
    %c0_13 = arith.constant 0 : index
    %22 = vector.load %arg7[%c0_12, %c0_13] : memref<2x128xf32, #tpu.memory_space<vmem>>, vector<2x128xf32>
    tpu.vector_store %arg7[%c0_12, %c0_13], %21 {strides = array<i32>} : memref<2x128xf32, #tpu.memory_space<vmem>>, vector<2x128xf32>,
    %23 = vector.extract_strided_slice %21 {offsets = [0, 0], sizes = [2, 64], strides = [1, 1]} : vector<2x128xf32> to vector<2x64xf32>
    %24 = vector.extract_strided_slice %21 {offsets = [0, 64], sizes = [2, 64], strides = [1, 1]} : vector<2x128xf32> to vector<2x64xf32>
    %25 = arith.maximumf %23, %24 : vector<2x64xf32>
    %26 = vector.extract_strided_slice %25 {offsets = [0, 0], sizes = [2, 32], strides = [1, 1]} : vector<2x64xf32> to vector<2x32xf32>
    %27 = vector.extract_strided_slice %25 {offsets = [0, 32], sizes = [2, 32], strides = [1, 1]} : vector<2x64xf32> to vector<2x32xf32>
    %28 = arith.maximumf %26, %27 : vector<2x32xf32>
    %29 = vector.extract_strided_slice %28 {offsets = [0, 0], sizes = [2, 16], strides = [1, 1]} : vector<2x32xf32> to vector<2x16xf32>
    %30 = vector.extract_strided_slice %28 {offsets = [0, 16], sizes = [2, 16], strides = [1, 1]} : vector<2x32xf32> to vector<2x16xf32>
    %31 = arith.maximumf %29, %30 : vector<2x16xf32>
    %32 = vector.extract_strided_slice %31 {offsets = [0, 0], sizes = [2, 8], strides = [1, 1]} : vector<2x16xf32> to vector<2x8xf32>
    %33 = vector.extract_strided_slice %31 {offsets = [0, 8], sizes = [2, 8], strides = [1, 1]} : vector<2x16xf32> to vector<2x8xf32>
    %34 = arith.maximumf %32, %33 : vector<2x8xf32>
    %cst_14 = arith.constant dense<0xFF800000> : vector<2xf32>
    %35 = vector.multi_reduction <maximumf>, %34, %cst_14 [1] : vector<2x8xf32> to vector<2xf32>
    %36 = vector.shape_cast %35 : vector<2xf32> to vector<2x1xf32>
    %37 = vector.broadcast %36 : vector<2x1xf32> to vector<2x8xf32>
    %38 = arith.subf %34, %37 : vector<2x8xf32>
    %39 = math.exp %38 : vector<2x8xf32>
    %cst_15 = arith.constant dense<0.000000e+00> : vector<2xf32>
    %40 = vector.multi_reduction <add>, %39, %cst_15 [1] : vector<2x8xf32> to vector<2xf32>
    %41 = vector.shape_cast %40 : vector<2xf32> to vector<2x1xf32>
    %42 = math.log %41 : vector<2x1xf32>
    %43 = arith.addf %42, %36 : vector<2x1xf32>
    %44 = vector.broadcast %43 : vector<2x1xf32> to vector<2x8xf32>
    %45 = arith.subf %34, %44 : vector<2x8xf32>
    %c0_16 = arith.constant 0 : index
    %c0_17 = arith.constant 0 : index
    %46 = vector.load %arg6[%c0_16, %c0_17] : memref<2x8xf32, #tpu.memory_space<vmem>>, vector<2x8xf32>
    tpu.vector_store %arg6[%c0_16, %c0_17], %45 {strides = array<i32>} : memref<2x8xf32, #tpu.memory_space<vmem>>, vector<2x8xf32>,
    return
  }
  func.func @transform_0(%arg0: i32) -> (i32, i32) {
    %c0_i32 = arith.constant 0 : i32
    %c0_i32_0 = arith.constant 0 : i32
    return %arg0, %c0_i32 : i32, i32
  }
  func.func @transform_1(%arg0: i32) -> (i32, i32) {
    %c0_i32 = arith.constant 0 : i32
    %c0_i32_0 = arith.constant 0 : i32
    %c0_i32_1 = arith.constant 0 : i32
    return %c0_i32, %c0_i32_0 : i32, i32
  }
  func.func @transform_2(%arg0: i32) -> (i32, i32) {
    %c0_i32 = arith.constant 0 : i32
    %c0_i32_0 = arith.constant 0 : i32
    %c0_i32_1 = arith.constant 0 : i32
    return %c0_i32, %c0_i32_0 : i32, i32
  }
  func.func @transform_3(%arg0: i32) -> (i32, i32) {
    %c0_i32 = arith.constant 0 : i32
    %c0_i32_0 = arith.constant 0 : i32
    %c0_i32_1 = arith.constant 0 : i32
    return %c0_i32, %c0_i32_0 : i32, i32
  }
  func.func @transform_4(%arg0: i32) -> (i32, i32) {
    %c0_i32 = arith.constant 0 : i32
    %c0_i32_0 = arith.constant 0 : i32
    %c0_i32_1 = arith.constant 0 : i32
    return %c0_i32, %c0_i32_0 : i32, i32
  }
  func.func @transform_5(%arg0: i32) -> (i32, i32) {
    %c0_i32 = arith.constant 0 : i32
    %c0_i32_0 = arith.constant 0 : i32
    return %arg0, %c0_i32 : i32, i32
  }
  func.func @transform_6(%arg0: i32) -> (i32, i32) {
    %c0_i32 = arith.constant 0 : i32
    %c0_i32_0 = arith.constant 0 : i32
    return %arg0, %c0_i32 : i32, i32
  }
}

</mosaic_0001>

<bundles_post_ra>
// kernel: tpu_custom_call.1
= control target key start
LH: loop header
LB: loop body
LE: loop exit
PB: predicated region body
PF: predicated region fallthrough
CT: control target
= control target key end

     0   :  { %12 = vsyncpa [#allocation3], 0  ;;  %s1179_s0 = inlined_call_operand.hbm [shape: f32[2,64], index: 0, kind: input, shape index: {}]   ;;  %s1180_s1 = inlined_call_operand.hbm [shape: f32[64,512], index: 1, kind: input, shape index: {}]   ;;  %s1181_s2 = inlined_call_operand.hbm [shape: f32[1,512], index: 2, kind: input, shape index: {}]   ;;  %s1182_s3 = inlined_call_operand.hbm [shape: f32[512,512], index: 3, kind: input, shape index: {}]   ;;  %s1183_s4 = inlined_call_operand.vmem [shape: f32[1,512], index: 4, kind: input, shape index: {}]   ;;  %s1184_s5 = inlined_call_operand.hbm [shape: f32[2,8], index: 5, kind: output, shape index: {0}]   ;;  %s1185_s6 = inlined_call_operand.hbm [shape: f32[2,128], index: 6, kind: output, shape index: {1}]  }
   0x1   :  { %13 = vsyncpa [#allocation6], 0 }
   0x2   :  { %14 = vsyncpa [#allocation9], 0 }
   0x3   :  { %15 = vsyncpa [#allocation4], 0 }
   0x4   :  { %16 = vsyncpa [#allocation12], 0  ;;  %s1065_s21 = smov [#allocation5]  }
   0x5   :  { %s32_s22 = sshll.u32 %s1065_s21, 4  ;;  %s33_s22 = int_to_ptr.vmem [resolvable:$true] %s32_s22 }
   0x6   :  { %s943_s23 = scalar_lea.vmem %s33_s22, 4096  ;;  %p948_p1 = scmp.lt.s32.totalorder %s33_s22, %s33_s22 }
   0x7   :  { %p944_p0 = scmp.ne.s32.totalorder %s33_s22, %s943_s23  ;;  %p949_p2 = scmp.lt.s32.totalorder %s943_s23, %s943_s23 }
   0x9   :  { %p950_p3 = por %p949_p2, %p948_p1 }
   0xb   :  { %p951_p4 = pnand %p950_p3, %p944_p0 }
   0xd   :  { %954 = shalt.err (!%p951_p4)
}
   0xe   :  { %s1066_s24 = smov 512   ;;  %s1067_s25 = smov 32  }
   0xf   :  { %38 = dma.hbm_to_vmem [thread:$0]  %s1180_s1, 4096, %s33_s22, [#allocation6], %s1066_s24, %s1066_s24, %s1067_s25  }
  0x10   :  { %s1068_s28 = smov [#allocation2]   ;;  %s1069_s30 = smov [#allocation7]  }
  0x11   :  { %s23_s29 = sshll.u32 %s1068_s28, 4  ;;  %s45_s7 = sshll.u32 %s1069_s30, 4  ;;  %s24_s29 = int_to_ptr.vmem [resolvable:$true] %s23_s29  ;;  %s46_s7 = int_to_ptr.vmem [resolvable:$true] %s45_s7 }
  0x12   :  { %s963_s8 = scalar_lea.vmem %s24_s29, 32  ;;  %p968_p6 = scmp.lt.s32.totalorder %s24_s29, %s24_s29 }
  0x13   :  { %p964_p5 = scmp.ne.s32.totalorder %s24_s29, %s963_s8  ;;  %p969_p7 = scmp.lt.s32.totalorder %s963_s8, %s963_s8 }
  0x15   :  { %p970_p8 = por %p969_p7, %p968_p6 }
  0x17   :  { %p971_p9 = pnand %p970_p8, %p964_p5 }
  0x19   :  { %974 = shalt.err (!%p971_p9)
}
  0x1a   :  { %26 = dma.hbm_to_vmem [thread:$0]  %s1179_s0, 32, %s24_s29, [#allocation3]  }
  0x1b   :  { %s983_s11 = scalar_lea.vmem %s46_s7, 64  ;;  %p988_p11 = scmp.lt.s32.totalorder %s46_s7, %s46_s7 }
  0x1c   :  { %p984_p10 = scmp.ne.s32.totalorder %s46_s7, %s983_s11  ;;  %p989_p12 = scmp.lt.s32.totalorder %s983_s11, %s983_s11 }
  0x1e   :  { %p990_p13 = por %p989_p12, %p988_p11 }
  0x20   :  { %p991_p0 = pnand %p990_p13, %p984_p10 }
  0x22   :  { %994 = shalt.err (!%p991_p0)
}
  0x23   :  { %48 = dma.hbm_to_vmem [thread:$0]  %s1181_s2, 64, %s46_s7, [#allocation6]  }
  0x24   :  { %s1070_s13 = smov [#allocation8]  }
  0x25   :  { %s54_s14 = sshll.u32 %s1070_s13, 4  ;;  %s55_s14 = int_to_ptr.vmem [resolvable:$true] %s54_s14 }
  0x26   :  { %s1003_s15 = scalar_lea.vmem %s55_s14, 32768  ;;  %p1008_p2 = scmp.lt.s32.totalorder %s55_s14, %s55_s14 }
  0x27   :  { %p1004_p1 = scmp.ne.s32.totalorder %s55_s14, %s1003_s15  ;;  %p1009_p3 = scmp.lt.s32.totalorder %s1003_s15, %s1003_s15 }
  0x29   :  { %p1010_p4 = por %p1009_p3, %p1008_p2 }
  0x2b   :  { %p1011_p5 = pnand %p1010_p4, %p1004_p1 }
  0x2d   :  { %1014 = shalt.err (!%p1011_p5)
}
  0x2e   :  { %60 = dma.hbm_to_vmem [thread:$0]  %s1182_s3, 32768, %s55_s14, [#allocation9], %s1066_s24, %s1066_s24, %s1067_s25  }
  0x2f   :  { %1055 = dma.done.wait [#allocation3], 32  }
  0x30   :  { %1056 = vsyncadd [#allocation3], 4294967264 }
  0x31   :  { %1057 = dma.done.wait [#allocation6], 4160  }
  0x32   :  { %1058 = vsyncadd [#allocation6], 4294963136 }
  0x33   :  { %1059 = dma.done.wait [#allocation9], 32768  }
  0x34   :  { %1060 = vsyncadd [#allocation9], 4294934528  ;;  %v1071_v0 = vmov 0.0   ;;  %v105_v1 = vld [vmem:[#allocation5 + $0xe8] sm:$0xff]  ;;  %v107_v2 = vld [vmem:[#allocation5 + $0xf8] sm:$0xff]  ;;  %vm130_vm0 = vcmask 523264  }
  0x35   :  { %198 = vmatprep.mubr.f32.mxu0 %v1071_v0  ;;  %269 = vmatprep.mubr.f32.mxu1 %v1071_v0  ;;  %v104_v3 = vld [vmem:[#allocation5 + $0xe0] sm:$0xff]  ;;  %v106_v4 = vld [vmem:[#allocation5 + $0xf0] sm:$0xff]  ;;  %v101_v5 = vld [vmem:[#allocation5 + $0xc8] sm:$0xff]  ;;  %s1073_s17 = smov 96   ;;  %s1074_s18 = smov 112   ;;  %vm870_vm1 = vcmask 58368  }
  0x36   :  { %150 = vmatprep.subr.mxu0 %v105_v1  ;;  %221 = vmatprep.subr.mxu1 %v107_v2  ;;  %v103_v6 = vld [vmem:[#allocation5 + $0xd8] sm:$0xff]  ;;  %v100_v7 = vld [vmem:[#allocation5 + $0xc0] sm:$0xff]  ;;  %v102_v8 = vld [vmem:[#allocation5 + $0xd0] sm:$0xff]  ;;  %s1075_s19 = smov 120   ;;  %s1076_s20 = smov [#allocation11]  }
  0x37   :  { %151 = vmatpush1.msra.mxu0 %v104_v3  ;;  %222 = vmatpush1.msra.mxu1 %v106_v4  ;;  %v97_v9 = vld [vmem:[#allocation5 + $0xa8] sm:$0xff]  ;;  %v99_v10 = vld [vmem:[#allocation5 + $0xb8] sm:$0xff]  ;;  %v96_v11 = vld [vmem:[#allocation5 + $0xa0] sm:$0xff]  ;;  %s901_s21 = sshll.u32 %s1076_s20, 4  ;;  %s902_s21 = int_to_ptr.vmem [resolvable:$true] %s901_s21 }
  0x38   :  { %152 = vmatprep.subr.mxu0 %v101_v5  ;;  %223 = vmatprep.subr.mxu1 %v103_v6  ;;  %v98_v12 = vld [vmem:[#allocation5 + $0xb0] sm:$0xff]  ;;  %v93_v13 = vld [vmem:[#allocation5 + $0x88] sm:$0xff]  ;;  %v95_v14 = vld [vmem:[#allocation5 + $0x98] sm:$0xff]  ;;  %s1015_s22 = scalar_lea.vmem %s902_s21, 32  ;;  %p1020_p7 = scmp.lt.s32.totalorder %s902_s21, %s902_s21 }
  0x39   :  { %153 = vmatpush1.msra.mxu0 %v100_v7  ;;  %224 = vmatpush1.msra.mxu1 %v102_v8  ;;  %v92_v15 = vld [vmem:[#allocation5 + $0x80] sm:$0xff]  ;;  %v94_v16 = vld [vmem:[#allocation5 + $0x90] sm:$0xff]  ;;  %v89_v17 = vld [vmem:[#allocation5 + $0x68] sm:$0xff]  ;;  %p1016_p6 = scmp.ne.s32.totalorder %s902_s21, %s1015_s22  ;;  %p1021_p8 = scmp.lt.s32.totalorder %s1015_s22, %s1015_s22 }
  0x3a   :  { %154 = vmatprep.subr.mxu0 %v97_v9  ;;  %225 = vmatprep.subr.mxu1 %v99_v10  ;;  %v91_v18 = vld [vmem:[#allocation5 + $0x78] sm:$0xff]  ;;  %v88_v19 = vld [vmem:[#allocation5 + $0x60] sm:$0xff]  ;;  %v90_v20 = vld [vmem:[#allocation5 + $0x70] sm:$0xff] }
  0x3b   :  { %155 = vmatpush1.msra.mxu0 %v96_v11  ;;  %226 = vmatpush1.msra.mxu1 %v98_v12  ;;  %v85_v21 = vld [vmem:[#allocation5 + $0x48] sm:$0xff]  ;;  %v87_v22 = vld [vmem:[#allocation5 + $0x58] sm:$0xff]  ;;  %v84_v23 = vld [vmem:[#allocation5 + $0x40] sm:$0xff]  ;;  %p1022_p9 = por %p1021_p8, %p1020_p7 }
  0x3c   :  { %156 = vmatprep.subr.mxu0 %v93_v13  ;;  %227 = vmatprep.subr.mxu1 %v95_v14  ;;  %v86_v24 = vld [vmem:[#allocation5 + $0x50] sm:$0xff]  ;;  %v81_v25 = vld [vmem:[#allocation5 + $0x28] sm:$0xff]  ;;  %v83_v26 = vld [vmem:[#allocation5 + $0x38] sm:$0xff] }
  0x3d   :  { %157 = vmatpush1.msra.mxu0 %v92_v15  ;;  %228 = vmatpush1.msra.mxu1 %v94_v16  ;;  %v80_v27 = vld [vmem:[#allocation5 + $0x20] sm:$0xff]  ;;  %v82_v28 = vld [vmem:[#allocation5 + $0x30] sm:$0xff]  ;;  %v77_v29 = vld [vmem:[#allocation5 + $0x8] sm:$0xff]  ;;  %p1023_p10 = pnand %p1022_p9, %p1016_p6 }
  0x3e   :  { %158 = vmatprep.subr.mxu0 %v89_v17  ;;  %229 = vmatprep.subr.mxu1 %v91_v18  ;;  %v79_v30 = vld [vmem:[#allocation5 + $0x18] sm:$0xff]  ;;  %v76_v31 = vld [vmem:[#allocation5] sm:$0xff]  ;;  %v78_v32 = vld [vmem:[#allocation5 + $0x10] sm:$0xff] }
  0x3f   :  { %159 = vmatpush1.msra.mxu0 %v88_v19  ;;  %230 = vmatpush1.msra.mxu1 %v90_v20  ;;  %v75_v33 = vld [vmem:[#allocation2] sm:$0x3]  ;;  %v341_v34 = vld [vmem:[#allocation8 + $0x1e8] sm:$0xff]  ;;  %v340_v36 = vld [vmem:[#allocation8 + $0x1e0] sm:$0xff] }
  0x40   :  { %160 = vmatprep.subr.mxu0 %v85_v21  ;;  %231 = vmatprep.subr.mxu1 %v87_v22  ;;  %v469_v35 = vld [vmem:[#allocation8 + $0x5e8] sm:$0xff]  ;;  %v468_v37 = vld [vmem:[#allocation8 + $0x5e0] sm:$0xff] }
  0x41   :  { %161 = vmatpush1.msra.mxu0 %v84_v23  ;;  %232 = vmatpush1.msra.mxu1 %v86_v24  ;;  %v337_v38 = vld [vmem:[#allocation8 + $0x1c8] sm:$0xff]  ;;  %v336_v40 = vld [vmem:[#allocation8 + $0x1c0] sm:$0xff] }
  0x42   :  { %162 = vmatprep.subr.mxu0 %v81_v25  ;;  %233 = vmatprep.subr.mxu1 %v83_v26  ;;  %v465_v39 = vld [vmem:[#allocation8 + $0x5c8] sm:$0xff]  ;;  %v464_v41 = vld [vmem:[#allocation8 + $0x5c0] sm:$0xff] }
  0x43   :  { %163 = vmatpush1.msra.mxu0 %v80_v27  ;;  %234 = vmatpush1.msra.mxu1 %v82_v28  ;;  %v333_v42 = vld [vmem:[#allocation8 + $0x1a8] sm:$0xff]  ;;  %v332_v44 = vld [vmem:[#allocation8 + $0x1a0] sm:$0xff] }
  0x44   :  { %164 = vmatprep.subr.mxu0 %v77_v29  ;;  %235 = vmatprep.subr.mxu1 %v79_v30  ;;  %v461_v43 = vld [vmem:[#allocation8 + $0x5a8] sm:$0xff]  ;;  %v460_v45 = vld [vmem:[#allocation8 + $0x5a0] sm:$0xff] }
  0x45   :  { %165 = vmatpush1.msra.mxu0 %v76_v31  ;;  %236 = vmatpush1.msra.mxu1 %v78_v32  ;;  %v329_v46 = vld [vmem:[#allocation8 + $0x188] sm:$0xff]  ;;  %v328_v48 = vld [vmem:[#allocation8 + $0x180] sm:$0xff] }
  0x46   :  { %916 = vmatmul.mubr.msk.f32.vlgmr.msra.gmra.mxu0 %vm130_vm0, %v75_v33  ;;  %917 = vmatmul.mubr.msk.f32.vlgmr.msra.gmra.mxu1 %vm130_vm0, %v75_v33  ;;  %v457_v47 = vld [vmem:[#allocation8 + $0x588] sm:$0xff]  ;;  %v456_v49 = vld [vmem:[#allocation8 + $0x580] sm:$0xff] }
  0x47   :  { %558 = vmatprep.subr.mxu0 %v341_v34  ;;  %629 = vmatprep.subr.mxu1 %v469_v35  ;;  %v325_v50 = vld [vmem:[#allocation8 + $0x168] sm:$0xff]  ;;  %v324_v52 = vld [vmem:[#allocation8 + $0x160] sm:$0xff] }
  0x48   :  { %559 = vmatpush1.msra.mxu0 %v340_v36  ;;  %630 = vmatpush1.msra.mxu1 %v468_v37  ;;  %v453_v51 = vld [vmem:[#allocation8 + $0x568] sm:$0xff]  ;;  %v452_v53 = vld [vmem:[#allocation8 + $0x560] sm:$0xff] }
  0x49   :  { %560 = vmatprep.subr.mxu0 %v337_v38  ;;  %631 = vmatprep.subr.mxu1 %v465_v39  ;;  %v321_v54 = vld [vmem:[#allocation8 + $0x148] sm:$0xff]  ;;  %v320_v56 = vld [vmem:[#allocation8 + $0x140] sm:$0xff] }
  0x4a   :  { %561 = vmatpush1.msra.mxu0 %v336_v40  ;;  %632 = vmatpush1.msra.mxu1 %v464_v41  ;;  %v449_v55 = vld [vmem:[#allocation8 + $0x548] sm:$0xff]  ;;  %v448_v57 = vld [vmem:[#allocation8 + $0x540] sm:$0xff] }
  0x4b   :  { %562 = vmatprep.subr.mxu0 %v333_v42  ;;  %633 = vmatprep.subr.mxu1 %v461_v43  ;;  %v317_v58 = vld [vmem:[#allocation8 + $0x128] sm:$0xff]  ;;  %v316_v60 = vld [vmem:[#allocation8 + $0x120] sm:$0xff] }
  0x4c   :  { %563 = vmatpush1.msra.mxu0 %v332_v44  ;;  %634 = vmatpush1.msra.mxu1 %v460_v45  ;;  %v445_v59 = vld [vmem:[#allocation8 + $0x528] sm:$0xff]  ;;  %v444_v61 = vld [vmem:[#allocation8 + $0x520] sm:$0xff] }
  0x4d   :  { %564 = vmatprep.subr.mxu0 %v329_v46  ;;  %635 = vmatprep.subr.mxu1 %v457_v47  ;;  %v313_v62 = vld [vmem:[#allocation8 + $0x108] sm:$0xff]  ;;  %v312_v0 = vld [vmem:[#allocation8 + $0x100] sm:$0xff] }
  0x4e   :  { %565 = vmatpush1.msra.mxu0 %v328_v48  ;;  %636 = vmatpush1.msra.mxu1 %v456_v49  ;;  %v441_v63 = vld [vmem:[#allocation8 + $0x508] sm:$0xff]  ;;  %v440_v1 = vld [vmem:[#allocation8 + $0x500] sm:$0xff] }
  0x4f   :  { %566 = vmatprep.subr.mxu0 %v325_v50  ;;  %637 = vmatprep.subr.mxu1 %v453_v51  ;;  %v309_v2 = vld [vmem:[#allocation8 + $0xe8] sm:$0xff]  ;;  %v308_v4 = vld [vmem:[#allocation8 + $0xe0] sm:$0xff] }
  0x50   :  { %567 = vmatpush1.msra.mxu0 %v324_v52  ;;  %638 = vmatpush1.msra.mxu1 %v452_v53  ;;  %v437_v3 = vld [vmem:[#allocation8 + $0x4e8] sm:$0xff]  ;;  %v436_v5 = vld [vmem:[#allocation8 + $0x4e0] sm:$0xff] }
  0x51   :  { %568 = vmatprep.subr.mxu0 %v321_v54  ;;  %639 = vmatprep.subr.mxu1 %v449_v55  ;;  %v305_v6 = vld [vmem:[#allocation8 + $0xc8] sm:$0xff]  ;;  %v304_v8 = vld [vmem:[#allocation8 + $0xc0] sm:$0xff] }
  0x52   :  { %569 = vmatpush1.msra.mxu0 %v320_v56  ;;  %640 = vmatpush1.msra.mxu1 %v448_v57  ;;  %v433_v7 = vld [vmem:[#allocation8 + $0x4c8] sm:$0xff]  ;;  %v432_v9 = vld [vmem:[#allocation8 + $0x4c0] sm:$0xff] }
  0x53   :  { %570 = vmatprep.subr.mxu0 %v317_v58  ;;  %641 = vmatprep.subr.mxu1 %v445_v59  ;;  %v301_v10 = vld [vmem:[#allocation8 + $0xa8] sm:$0xff]  ;;  %v300_v12 = vld [vmem:[#allocation8 + $0xa0] sm:$0xff] }
  0x54   :  { %571 = vmatpush1.msra.mxu0 %v316_v60  ;;  %642 = vmatpush1.msra.mxu1 %v444_v61  ;;  %v429_v11 = vld [vmem:[#allocation8 + $0x4a8] sm:$0xff]  ;;  %v428_v13 = vld [vmem:[#allocation8 + $0x4a0] sm:$0xff] }
  0x55   :  { %572 = vmatprep.subr.mxu0 %v313_v62  ;;  %643 = vmatprep.subr.mxu1 %v441_v63  ;;  %v297_v14 = vld [vmem:[#allocation8 + $0x88] sm:$0xff]  ;;  %v296_v16 = vld [vmem:[#allocation8 + $0x80] sm:$0xff] }
  0x56   :  { %573 = vmatpush1.msra.mxu0 %v312_v0  ;;  %644 = vmatpush1.msra.mxu1 %v440_v1  ;;  %v425_v15 = vld [vmem:[#allocation8 + $0x488] sm:$0xff]  ;;  %v424_v17 = vld [vmem:[#allocation8 + $0x480] sm:$0xff] }
  0x57   :  { %574 = vmatprep.subr.mxu0 %v309_v2  ;;  %645 = vmatprep.subr.mxu1 %v437_v3  ;;  %v293_v18 = vld [vmem:[#allocation8 + $0x68] sm:$0xff]  ;;  %v292_v20 = vld [vmem:[#allocation8 + $0x60] sm:$0xff] }
  0x58   :  { %575 = vmatpush1.msra.mxu0 %v308_v4  ;;  %646 = vmatpush1.msra.mxu1 %v436_v5  ;;  %v421_v19 = vld [vmem:[#allocation8 + $0x468] sm:$0xff]  ;;  %v420_v21 = vld [vmem:[#allocation8 + $0x460] sm:$0xff] }
  0x59   :  { %576 = vmatprep.subr.mxu0 %v305_v6  ;;  %647 = vmatprep.subr.mxu1 %v433_v7  ;;  %v289_v22 = vld [vmem:[#allocation8 + $0x48] sm:$0xff]  ;;  %v288_v24 = vld [vmem:[#allocation8 + $0x40] sm:$0xff] }
  0x5a   :  { %577 = vmatpush1.msra.mxu0 %v304_v8  ;;  %648 = vmatpush1.msra.mxu1 %v432_v9  ;;  %v417_v23 = vld [vmem:[#allocation8 + $0x448] sm:$0xff]  ;;  %v416_v25 = vld [vmem:[#allocation8 + $0x440] sm:$0xff] }
  0x5b   :  { %578 = vmatprep.subr.mxu0 %v301_v10  ;;  %649 = vmatprep.subr.mxu1 %v429_v11  ;;  %v285_v26 = vld [vmem:[#allocation8 + $0x28] sm:$0xff]  ;;  %v284_v28 = vld [vmem:[#allocation8 + $0x20] sm:$0xff] }
  0x5c   :  { %579 = vmatpush1.msra.mxu0 %v300_v12  ;;  %650 = vmatpush1.msra.mxu1 %v428_v13  ;;  %v413_v27 = vld [vmem:[#allocation8 + $0x428] sm:$0xff]  ;;  %v412_v29 = vld [vmem:[#allocation8 + $0x420] sm:$0xff] }
  0x5d   :  { %580 = vmatprep.subr.mxu0 %v297_v14  ;;  %651 = vmatprep.subr.mxu1 %v425_v15  ;;  %v281_v30 = vld [vmem:[#allocation8 + $0x8] sm:$0xff]  ;;  %v280_v32 = vld [vmem:[#allocation8] sm:$0xff] }
  0x5e   :  { %581 = vmatpush1.msra.mxu0 %v296_v16  ;;  %652 = vmatpush1.msra.mxu1 %v424_v17  ;;  %v409_v31 = vld [vmem:[#allocation8 + $0x408] sm:$0xff]  ;;  %v408_v33 = vld [vmem:[#allocation8 + $0x400] sm:$0xff] }
  0x5f   :  { %582 = vmatprep.subr.mxu0 %v293_v18  ;;  %653 = vmatprep.subr.mxu1 %v421_v19  ;;  %v405_v34 = vld [vmem:[#allocation8 + $0x3e8] sm:$0xff]  ;;  %v404_v36 = vld [vmem:[#allocation8 + $0x3e0] sm:$0xff] }
  0x60   :  { %583 = vmatpush1.msra.mxu0 %v292_v20  ;;  %654 = vmatpush1.msra.mxu1 %v420_v21  ;;  %v533_v35 = vld [vmem:[#allocation8 + $0x7e8] sm:$0xff]  ;;  %v532_v37 = vld [vmem:[#allocation8 + $0x7e0] sm:$0xff] }
  0x61   :  { %584 = vmatprep.subr.mxu0 %v289_v22  ;;  %655 = vmatprep.subr.mxu1 %v417_v23  ;;  %v401_v38 = vld [vmem:[#allocation8 + $0x3c8] sm:$0xff]  ;;  %v400_v40 = vld [vmem:[#allocation8 + $0x3c0] sm:$0xff] }
  0x62   :  { %585 = vmatpush1.msra.mxu0 %v288_v24  ;;  %656 = vmatpush1.msra.mxu1 %v416_v25  ;;  %v529_v39 = vld [vmem:[#allocation8 + $0x7c8] sm:$0xff]  ;;  %v528_v41 = vld [vmem:[#allocation8 + $0x7c0] sm:$0xff] }
  0x63   :  { %586 = vmatprep.subr.mxu0 %v285_v26  ;;  %657 = vmatprep.subr.mxu1 %v413_v27  ;;  %v397_v42 = vld [vmem:[#allocation8 + $0x3a8] sm:$0xff]  ;;  %v396_v44 = vld [vmem:[#allocation8 + $0x3a0] sm:$0xff] }
  0x64   :  { %587 = vmatpush1.msra.mxu0 %v284_v28  ;;  %658 = vmatpush1.msra.mxu1 %v412_v29  ;;  %v525_v43 = vld [vmem:[#allocation8 + $0x7a8] sm:$0xff]  ;;  %v524_v45 = vld [vmem:[#allocation8 + $0x7a0] sm:$0xff] }
  0x65   :  { %588 = vmatprep.subr.mxu0 %v281_v30  ;;  %659 = vmatprep.subr.mxu1 %v409_v31  ;;  %v393_v46 = vld [vmem:[#allocation8 + $0x388] sm:$0xff]  ;;  %v392_v48 = vld [vmem:[#allocation8 + $0x380] sm:$0xff] }
  0x66   :  { %589 = vmatpush1.msra.mxu0 %v280_v32  ;;  %660 = vmatpush1.msra.mxu1 %v408_v33  ;;  %v521_v47 = vld [vmem:[#allocation8 + $0x788] sm:$0xff]  ;;  %v520_v49 = vld [vmem:[#allocation8 + $0x780] sm:$0xff] }
  0x67   :  { %590 = vmatprep.subr.mxu0 %v405_v34  ;;  %661 = vmatprep.subr.mxu1 %v533_v35  ;;  %v389_v50 = vld [vmem:[#allocation8 + $0x368] sm:$0xff]  ;;  %v388_v52 = vld [vmem:[#allocation8 + $0x360] sm:$0xff]  ;;  %v343_v34 = vld [vmem:[#allocation8 + $0x1f8] sm:$0xff] }
  0x68   :  { %591 = vmatpush2.msra.mxu0 %v404_v36  ;;  %662 = vmatpush2.msra.mxu1 %v532_v37  ;;  %v517_v51 = vld [vmem:[#allocation8 + $0x768] sm:$0xff]  ;;  %v516_v53 = vld [vmem:[#allocation8 + $0x760] sm:$0xff]  ;;  %v471_v35 = vld [vmem:[#allocation8 + $0x5f8] sm:$0xff]  ;;  %v110_v36 = vlaneseq }
  0x69   :  { %592 = vmatprep.subr.mxu0 %v401_v38  ;;  %663 = vmatprep.subr.mxu1 %v529_v39  ;;  %v385_v54 = vld [vmem:[#allocation8 + $0x348] sm:$0xff]  ;;  %v384_v56 = vld [vmem:[#allocation8 + $0x340] sm:$0xff] }
  0x6a   :  { %593 = vmatpush2.msra.mxu0 %v400_v40  ;;  %664 = vmatpush2.msra.mxu1 %v528_v41  ;;  %v513_v55 = vld [vmem:[#allocation8 + $0x748] sm:$0xff]  ;;  %v512_v57 = vld [vmem:[#allocation8 + $0x740] sm:$0xff]  ;;  %v1131_v37 = vshrl.u32 %v110_v36, 7  ;;  %v108_v40 = vld [vmem:[#allocation7] sm:$0xf] }
  0x6b   :  { %594 = vmatprep.subr.mxu0 %v397_v42  ;;  %665 = vmatprep.subr.mxu1 %v525_v43  ;;  %v381_v58 = vld [vmem:[#allocation8 + $0x328] sm:$0xff]  ;;  %v380_v60 = vld [vmem:[#allocation8 + $0x320] sm:$0xff]  ;;  %v430_v36 = vld [vmem:[#allocation8 + $0x4b0] sm:$0xff] }
  0x6c   :  { %595 = vmatpush2.msra.mxu0 %v396_v44  ;;  %666 = vmatpush2.msra.mxu1 %v524_v45  ;;  %v509_v59 = vld [vmem:[#allocation8 + $0x728] sm:$0xff]  ;;  %v508_v61 = vld [vmem:[#allocation8 + $0x720] sm:$0xff]  ;;  %v120_v38 = vsub.s32 2, %v1131_v37  ;;  %v112_v39 = vsub.s32 0, %v1131_v37  ;;  %v116_v41 = vsub.s32 1, %v1131_v37  ;;  %v124_v42 = vsub.s32 3, %v1131_v37 }
  0x6d   :  { %596 = vmatprep.subr.mxu0 %v393_v46  ;;  %667 = vmatprep.subr.mxu1 %v521_v47  ;;  %v377_v62 = vld [vmem:[#allocation8 + $0x308] sm:$0xff]  ;;  %v376_v0 = vld [vmem:[#allocation8 + $0x300] sm:$0xff] }
  0x6e   :  { %597 = vmatpush2.msra.mxu0 %v392_v48  ;;  %668 = vmatpush2.msra.mxu1 %v520_v49  ;;  %v505_v63 = vld [vmem:[#allocation8 + $0x708] sm:$0xff]  ;;  %v504_v1 = vld [vmem:[#allocation8 + $0x700] sm:$0xff]  ;;  %v121_v43 = vrot.slane %v108_v40, %v120_v38  ;;  %v113_v44 = vrot.slane %v108_v40, %v112_v39  ;;  %v117_v45 = vrot.slane %v108_v40, %v116_v41 }
  0x6f   :  { %598 = vmatprep.subr.mxu0 %v389_v50  ;;  %669 = vmatprep.subr.mxu1 %v517_v51  ;;  %v373_v2 = vld [vmem:[#allocation8 + $0x2e8] sm:$0xff]  ;;  %v372_v4 = vld [vmem:[#allocation8 + $0x2e0] sm:$0xff]  ;;  %v125_v46 = vrot.slane %v108_v40, %v124_v42  ;;  %v299_v40 = vld [vmem:[#allocation8 + $0x98] sm:$0xff] }
  0x70   :  { %599 = vmatpush2.msra.mxu0 %v388_v52  ;;  %670 = vmatpush2.msra.mxu1 %v516_v53  ;;  %v501_v3 = vld [vmem:[#allocation8 + $0x6e8] sm:$0xff]  ;;  %v500_v5 = vld [vmem:[#allocation8 + $0x6e0] sm:$0xff] }
  0x71   :  { %600 = vmatprep.subr.mxu0 %v385_v54  ;;  %671 = vmatprep.subr.mxu1 %v513_v55  ;;  %v369_v6 = vld [vmem:[#allocation8 + $0x2c8] sm:$0xff]  ;;  %v368_v8 = vld [vmem:[#allocation8 + $0x2c0] sm:$0xff] }
  0x72   :  { %601 = vmatpush2.msra.mxu0 %v384_v56  ;;  %672 = vmatpush2.msra.mxu1 %v512_v57  ;;  %v497_v7 = vld [vmem:[#allocation8 + $0x6c8] sm:$0xff]  ;;  %v496_v9 = vld [vmem:[#allocation8 + $0x6c0] sm:$0xff] }
  0x73   :  { %602 = vmatprep.subr.mxu0 %v381_v58  ;;  %673 = vmatprep.subr.mxu1 %v509_v59  ;;  %v365_v10 = vld [vmem:[#allocation8 + $0x2a8] sm:$0xff]  ;;  %v364_v12 = vld [vmem:[#allocation8 + $0x2a0] sm:$0xff]  ;;  %v342_v59 = vld [vmem:[#allocation8 + $0x1f0] sm:$0xff] }
  0x74   :  { %603 = vmatpush2.msra.mxu0 %v380_v60  ;;  %674 = vmatpush2.msra.mxu1 %v508_v61  ;;  %v493_v11 = vld [vmem:[#allocation8 + $0x6a8] sm:$0xff]  ;;  %v492_v13 = vld [vmem:[#allocation8 + $0x6a0] sm:$0xff]  ;;  %v470_v60 = vld [vmem:[#allocation8 + $0x5f0] sm:$0xff] }
  0x75   :  { %604 = vmatprep.subr.mxu0 %v377_v62  ;;  %675 = vmatprep.subr.mxu1 %v505_v63  ;;  %v361_v14 = vld [vmem:[#allocation8 + $0x288] sm:$0xff]  ;;  %v360_v16 = vld [vmem:[#allocation8 + $0x280] sm:$0xff]  ;;  %v339_v61 = vld [vmem:[#allocation8 + $0x1d8] sm:$0xff] }
  0x76   :  { %605 = vmatpush2.msra.mxu0 %v376_v0  ;;  %676 = vmatpush2.msra.mxu1 %v504_v1  ;;  %v489_v15 = vld [vmem:[#allocation8 + $0x688] sm:$0xff]  ;;  %v488_v17 = vld [vmem:[#allocation8 + $0x680] sm:$0xff]  ;;  %v467_v62 = vld [vmem:[#allocation8 + $0x5d8] sm:$0xff] }
  0x77   :  { %606 = vmatprep.subr.mxu0 %v373_v2  ;;  %677 = vmatprep.subr.mxu1 %v501_v3  ;;  %v357_v18 = vld [vmem:[#allocation8 + $0x268] sm:$0xff]  ;;  %v356_v20 = vld [vmem:[#allocation8 + $0x260] sm:$0xff]  ;;  %v338_v63 = vld [vmem:[#allocation8 + $0x1d0] sm:$0xff] }
  0x78   :  { %607 = vmatpush2.msra.mxu0 %v372_v4  ;;  %678 = vmatpush2.msra.mxu1 %v500_v5  ;;  %v485_v19 = vld [vmem:[#allocation8 + $0x668] sm:$0xff]  ;;  %v484_v21 = vld [vmem:[#allocation8 + $0x660] sm:$0xff]  ;;  %v466_v0 = vld [vmem:[#allocation8 + $0x5d0] sm:$0xff] }
  0x79   :  { %608 = vmatprep.subr.mxu0 %v369_v6  ;;  %679 = vmatprep.subr.mxu1 %v497_v7  ;;  %v353_v22 = vld [vmem:[#allocation8 + $0x248] sm:$0xff]  ;;  %v352_v24 = vld [vmem:[#allocation8 + $0x240] sm:$0xff]  ;;  %v335_v1 = vld [vmem:[#allocation8 + $0x1b8] sm:$0xff] }
  0x7a   :  { %609 = vmatpush2.msra.mxu0 %v368_v8  ;;  %680 = vmatpush2.msra.mxu1 %v496_v9  ;;  %v481_v23 = vld [vmem:[#allocation8 + $0x648] sm:$0xff]  ;;  %v480_v25 = vld [vmem:[#allocation8 + $0x640] sm:$0xff]  ;;  %v463_v2 = vld [vmem:[#allocation8 + $0x5b8] sm:$0xff] }
  0x7b   :  { %610 = vmatprep.subr.mxu0 %v365_v10  ;;  %681 = vmatprep.subr.mxu1 %v493_v11  ;;  %v349_v26 = vld [vmem:[#allocation8 + $0x228] sm:$0xff]  ;;  %v348_v28 = vld [vmem:[#allocation8 + $0x220] sm:$0xff]  ;;  %v334_v3 = vld [vmem:[#allocation8 + $0x1b0] sm:$0xff] }
  0x7c   :  { %611 = vmatpush2.msra.mxu0 %v364_v12  ;;  %682 = vmatpush2.msra.mxu1 %v492_v13  ;;  %v477_v27 = vld [vmem:[#allocation8 + $0x628] sm:$0xff]  ;;  %v476_v29 = vld [vmem:[#allocation8 + $0x620] sm:$0xff]  ;;  %v462_v4 = vld [vmem:[#allocation8 + $0x5b0] sm:$0xff] }
  0x7d   :  { %612 = vmatprep.subr.mxu0 %v361_v14  ;;  %683 = vmatprep.subr.mxu1 %v489_v15  ;;  %v345_v30 = vld [vmem:[#allocation8 + $0x208] sm:$0xff]  ;;  %v344_v32 = vld [vmem:[#allocation8 + $0x200] sm:$0xff]  ;;  %v331_v5 = vld [vmem:[#allocation8 + $0x198] sm:$0xff] }
  0x7e   :  { %613 = vmatpush2.msra.mxu0 %v360_v16  ;;  %684 = vmatpush2.msra.mxu1 %v488_v17  ;;  %v473_v31 = vld [vmem:[#allocation8 + $0x608] sm:$0xff]  ;;  %v472_v33 = vld [vmem:[#allocation8 + $0x600] sm:$0xff]  ;;  %v459_v6 = vld [vmem:[#allocation8 + $0x598] sm:$0xff] }
  0x7f   :  { %614 = vmatprep.subr.mxu0 %v357_v18  ;;  %685 = vmatprep.subr.mxu1 %v485_v19  ;;  %v330_v7 = vld [vmem:[#allocation8 + $0x190] sm:$0xff]  ;;  %v327_v9 = vld [vmem:[#allocation8 + $0x178] sm:$0xff] }
  0x80   :  { %615 = vmatpush2.msra.mxu0 %v356_v20  ;;  %686 = vmatpush2.msra.mxu1 %v484_v21  ;;  %v458_v8 = vld [vmem:[#allocation8 + $0x590] sm:$0xff]  ;;  %v455_v10 = vld [vmem:[#allocation8 + $0x578] sm:$0xff] }
  0x81   :  { %616 = vmatprep.subr.mxu0 %v353_v22  ;;  %687 = vmatprep.subr.mxu1 %v481_v23  ;;  %v326_v11 = vld [vmem:[#allocation8 + $0x170] sm:$0xff]  ;;  %v323_v13 = vld [vmem:[#allocation8 + $0x158] sm:$0xff] }
  0x82   :  { %617 = vmatpush2.msra.mxu0 %v352_v24  ;;  %688 = vmatpush2.msra.mxu1 %v480_v25  ;;  %v454_v12 = vld [vmem:[#allocation8 + $0x570] sm:$0xff]  ;;  %v451_v14 = vld [vmem:[#allocation8 + $0x558] sm:$0xff] }
  0x83   :  { %618 = vmatprep.subr.mxu0 %v349_v26  ;;  %689 = vmatprep.subr.mxu1 %v477_v27  ;;  %v322_v15 = vld [vmem:[#allocation8 + $0x150] sm:$0xff]  ;;  %v319_v17 = vld [vmem:[#allocation8 + $0x138] sm:$0xff] }
  0x84   :  { %619 = vmatpush2.msra.mxu0 %v348_v28  ;;  %690 = vmatpush2.msra.mxu1 %v476_v29  ;;  %v450_v16 = vld [vmem:[#allocation8 + $0x550] sm:$0xff]  ;;  %v447_v18 = vld [vmem:[#allocation8 + $0x538] sm:$0xff] }
  0x85   :  { %620 = vmatprep.subr.mxu0 %v345_v30  ;;  %691 = vmatprep.subr.mxu1 %v473_v31  ;;  %v318_v19 = vld [vmem:[#allocation8 + $0x130] sm:$0xff]  ;;  %v315_v21 = vld [vmem:[#allocation8 + $0x118] sm:$0xff] }
  0x86   :  { %621 = vmatpush2.msra.mxu0 %v344_v32  ;;  %692 = vmatpush2.msra.mxu1 %v472_v33  ;;  %v446_v20 = vld [vmem:[#allocation8 + $0x530] sm:$0xff]  ;;  %v443_v22 = vld [vmem:[#allocation8 + $0x518] sm:$0xff] }
  0x87   :  { %700 = vmatprep.subr.mxu0 %v343_v34  ;;  %771 = vmatprep.subr.mxu1 %v471_v35  ;;  %v314_v23 = vld [vmem:[#allocation8 + $0x110] sm:$0xff]  ;;  %v311_v25 = vld [vmem:[#allocation8 + $0xf8] sm:$0xff] }
  0x88   :  { %v442_v24 = vld [vmem:[#allocation8 + $0x510] sm:$0xff]  ;;  %v439_v26 = vld [vmem:[#allocation8 + $0x4f8] sm:$0xff] }
  0x89   :  { %v310_v27 = vld [vmem:[#allocation8 + $0xf0] sm:$0xff]  ;;  %v307_v29 = vld [vmem:[#allocation8 + $0xd8] sm:$0xff] }
  0x8a   :  { %v438_v28 = vld [vmem:[#allocation8 + $0x4f0] sm:$0xff]  ;;  %v435_v30 = vld [vmem:[#allocation8 + $0x4d8] sm:$0xff] }
  0x8b   :  { %v306_v31 = vld [vmem:[#allocation8 + $0xd0] sm:$0xff]  ;;  %v303_v33 = vld [vmem:[#allocation8 + $0xb8] sm:$0xff] }
  0x8c   :  { %v434_v32 = vld [vmem:[#allocation8 + $0x4d0] sm:$0xff]  ;;  %v431_v34 = vld [vmem:[#allocation8 + $0x4b8] sm:$0xff] }
  0x8d   :  { %v302_v35 = vld [vmem:[#allocation8 + $0xb0] sm:$0xff] }
 0x106   :  { %v200_v47 = vpop.f32.mrf.mxu0  ;;  %v271_v48 = vpop.f32.mrf.mxu1 }
 0x107   :  { %v1145_v49 = vadd.f32 %v271_v48, %v121_v43  ;;  %v1147_v50 = vadd.f32 %v200_v47, %v113_v44  ;;  %v427_v43 = vld [vmem:[#allocation8 + $0x498] sm:$0xff]  ;;  %v298_v44 = vld [vmem:[#allocation8 + $0x90] sm:$0xff] }
 0x108   :  { %v202_v51 = vpop.f32.mrf.mxu0  ;;  %v273_v52 = vpop.f32.mrf.mxu1  ;;  %v423_v47 = vld [vmem:[#allocation8 + $0x478] sm:$0xff]  ;;  %v294_v48 = vld [vmem:[#allocation8 + $0x70] sm:$0xff] }
 0x109   :  { %v203_v53 = vadd.f32 %v202_v51, %v117_v45  ;;  %v274_v54 = vadd.f32 %v273_v52, %v125_v46  ;;  %v278_v55 = vmax.f32 %v1145_v49, 0.0  ;;  %v276_v58 = vmax.f32 %v1147_v50, 0.0  ;;  %v426_v45 = vld [vmem:[#allocation8 + $0x490] sm:$0xff]  ;;  %v295_v46 = vld [vmem:[#allocation8 + $0x78] sm:$0xff] }
 0x10a   :  { %v422_v51 = vld [vmem:[#allocation8 + $0x470] sm:$0xff]  ;;  %v291_v52 = vld [vmem:[#allocation8 + $0x58] sm:$0xff] }
 0x10b   :  { %v277_v56 = vmax.f32 %v203_v53, 0.0  ;;  %v279_v57 = vmax.f32 %v274_v54, 0.0  ;;  %v419_v53 = vld [vmem:[#allocation8 + $0x458] sm:$0xff]  ;;  %v290_v54 = vld [vmem:[#allocation8 + $0x50] sm:$0xff] }
 0x10d   :  { %622 = vmatprep.mubr.f32.mxu0 %v277_v56  ;;  %693 = vmatprep.mubr.f32.mxu1 %v279_v57 }
 0x10e   :  { %623 = vmatmul.mubr.f32.vlgmr.msra.gmra.mxu0 %v276_v58  ;;  %694 = vmatmul.mubr.f32.vlgmr.msra.gmra.mxu1 %v278_v55 }
 0x10f   :  { %701 = vmatpush1.msra.mxu0 %v342_v59  ;;  %772 = vmatpush1.msra.mxu1 %v470_v60  ;;  %v415_v59 = vld [vmem:[#allocation8 + $0x438] sm:$0xff]  ;;  %v286_v60 = vld [vmem:[#allocation8 + $0x30] sm:$0xff] }
 0x110   :  { %702 = vmatprep.subr.mxu0 %v339_v61  ;;  %764 = vmatprep.mubr.f32.mxu0 %v277_v56  ;;  %v418_v56 = vld [vmem:[#allocation8 + $0x450] sm:$0xff] }
 0x111   :  { %773 = vmatprep.subr.mxu1 %v467_v62  ;;  %835 = vmatprep.mubr.f32.mxu1 %v279_v57  ;;  %v287_v57 = vld [vmem:[#allocation8 + $0x38] sm:$0xff]  ;;  %v414_v61 = vld [vmem:[#allocation8 + $0x430] sm:$0xff] }
 0x112   :  { %703 = vmatpush1.msra.mxu0 %v338_v63  ;;  %774 = vmatpush1.msra.mxu1 %v466_v0  ;;  %v283_v62 = vld [vmem:[#allocation8 + $0x18] sm:$0xff]  ;;  %v282_v0 = vld [vmem:[#allocation8 + $0x10] sm:$0xff] }
 0x113   :  { %704 = vmatprep.subr.mxu0 %v335_v1  ;;  %775 = vmatprep.subr.mxu1 %v463_v2  ;;  %v411_v63 = vld [vmem:[#allocation8 + $0x418] sm:$0xff]  ;;  %v410_v1 = vld [vmem:[#allocation8 + $0x410] sm:$0xff] }
 0x114   :  { %705 = vmatpush1.msra.mxu0 %v334_v3  ;;  %776 = vmatpush1.msra.mxu1 %v462_v4  ;;  %v407_v2 = vld [vmem:[#allocation8 + $0x3f8] sm:$0xff]  ;;  %v406_v4 = vld [vmem:[#allocation8 + $0x3f0] sm:$0xff] }
 0x115   :  { %706 = vmatprep.subr.mxu0 %v331_v5  ;;  %777 = vmatprep.subr.mxu1 %v459_v6  ;;  %v535_v3 = vld [vmem:[#allocation8 + $0x7f8] sm:$0xff]  ;;  %v534_v5 = vld [vmem:[#allocation8 + $0x7f0] sm:$0xff] }
 0x116   :  { %707 = vmatpush1.msra.mxu0 %v330_v7  ;;  %778 = vmatpush1.msra.mxu1 %v458_v8  ;;  %v403_v6 = vld [vmem:[#allocation8 + $0x3d8] sm:$0xff]  ;;  %v402_v8 = vld [vmem:[#allocation8 + $0x3d0] sm:$0xff] }
 0x117   :  { %708 = vmatprep.subr.mxu0 %v327_v9  ;;  %779 = vmatprep.subr.mxu1 %v455_v10  ;;  %v531_v7 = vld [vmem:[#allocation8 + $0x7d8] sm:$0xff]  ;;  %v530_v9 = vld [vmem:[#allocation8 + $0x7d0] sm:$0xff] }
 0x118   :  { %709 = vmatpush1.msra.mxu0 %v326_v11  ;;  %780 = vmatpush1.msra.mxu1 %v454_v12  ;;  %v399_v10 = vld [vmem:[#allocation8 + $0x3b8] sm:$0xff]  ;;  %v398_v12 = vld [vmem:[#allocation8 + $0x3b0] sm:$0xff] }
 0x119   :  { %710 = vmatprep.subr.mxu0 %v323_v13  ;;  %781 = vmatprep.subr.mxu1 %v451_v14  ;;  %v527_v11 = vld [vmem:[#allocation8 + $0x7b8] sm:$0xff]  ;;  %v526_v13 = vld [vmem:[#allocation8 + $0x7b0] sm:$0xff] }
 0x11a   :  { %711 = vmatpush1.msra.mxu0 %v322_v15  ;;  %782 = vmatpush1.msra.mxu1 %v450_v16  ;;  %v395_v14 = vld [vmem:[#allocation8 + $0x398] sm:$0xff]  ;;  %v394_v16 = vld [vmem:[#allocation8 + $0x390] sm:$0xff] }
 0x11b   :  { %712 = vmatprep.subr.mxu0 %v319_v17  ;;  %783 = vmatprep.subr.mxu1 %v447_v18  ;;  %v523_v15 = vld [vmem:[#allocation8 + $0x798] sm:$0xff]  ;;  %v522_v17 = vld [vmem:[#allocation8 + $0x790] sm:$0xff] }
 0x11c   :  { %713 = vmatpush1.msra.mxu0 %v318_v19  ;;  %784 = vmatpush1.msra.mxu1 %v446_v20  ;;  %v391_v18 = vld [vmem:[#allocation8 + $0x378] sm:$0xff]  ;;  %v390_v20 = vld [vmem:[#allocation8 + $0x370] sm:$0xff] }
 0x11d   :  { %714 = vmatprep.subr.mxu0 %v315_v21  ;;  %785 = vmatprep.subr.mxu1 %v443_v22  ;;  %v519_v19 = vld [vmem:[#allocation8 + $0x778] sm:$0xff]  ;;  %v518_v21 = vld [vmem:[#allocation8 + $0x770] sm:$0xff] }
 0x11e   :  { %715 = vmatpush1.msra.mxu0 %v314_v23  ;;  %786 = vmatpush1.msra.mxu1 %v442_v24  ;;  %v387_v22 = vld [vmem:[#allocation8 + $0x358] sm:$0xff]  ;;  %v386_v24 = vld [vmem:[#allocation8 + $0x350] sm:$0xff] }
 0x11f   :  { %716 = vmatprep.subr.mxu0 %v311_v25  ;;  %787 = vmatprep.subr.mxu1 %v439_v26  ;;  %v515_v23 = vld [vmem:[#allocation8 + $0x758] sm:$0xff]  ;;  %v514_v25 = vld [vmem:[#allocation8 + $0x750] sm:$0xff] }
 0x120   :  { %717 = vmatpush1.msra.mxu0 %v310_v27  ;;  %788 = vmatpush1.msra.mxu1 %v438_v28  ;;  %v383_v26 = vld [vmem:[#allocation8 + $0x338] sm:$0xff]  ;;  %v382_v28 = vld [vmem:[#allocation8 + $0x330] sm:$0xff] }
 0x121   :  { %718 = vmatprep.subr.mxu0 %v307_v29  ;;  %789 = vmatprep.subr.mxu1 %v435_v30  ;;  %v511_v27 = vld [vmem:[#allocation8 + $0x738] sm:$0xff]  ;;  %v510_v29 = vld [vmem:[#allocation8 + $0x730] sm:$0xff] }
 0x122   :  { %719 = vmatpush1.msra.mxu0 %v306_v31  ;;  %790 = vmatpush1.msra.mxu1 %v434_v32  ;;  %v379_v30 = vld [vmem:[#allocation8 + $0x318] sm:$0xff]  ;;  %v378_v32 = vld [vmem:[#allocation8 + $0x310] sm:$0xff] }
 0x123   :  { %720 = vmatprep.subr.mxu0 %v303_v33  ;;  %791 = vmatprep.subr.mxu1 %v431_v34  ;;  %v507_v31 = vld [vmem:[#allocation8 + $0x718] sm:$0xff]  ;;  %v506_v33 = vld [vmem:[#allocation8 + $0x710] sm:$0xff] }
 0x124   :  { %721 = vmatpush1.msra.mxu0 %v302_v35  ;;  %792 = vmatpush1.msra.mxu1 %v430_v36  ;;  %v375_v34 = vld [vmem:[#allocation8 + $0x2f8] sm:$0xff]  ;;  %v374_v36 = vld [vmem:[#allocation8 + $0x2f0] sm:$0xff] }
 0x125   :  { %722 = vmatprep.subr.mxu0 %v299_v40  ;;  %793 = vmatprep.subr.mxu1 %v427_v43  ;;  %v503_v35 = vld [vmem:[#allocation8 + $0x6f8] sm:$0xff]  ;;  %v502_v40 = vld [vmem:[#allocation8 + $0x6f0] sm:$0xff] }
 0x126   :  { %723 = vmatpush1.msra.mxu0 %v298_v44  ;;  %794 = vmatpush1.msra.mxu1 %v426_v45  ;;  %v371_v43 = vld [vmem:[#allocation8 + $0x2d8] sm:$0xff]  ;;  %v370_v45 = vld [vmem:[#allocation8 + $0x2d0] sm:$0xff] }
 0x127   :  { %724 = vmatprep.subr.mxu0 %v295_v46  ;;  %795 = vmatprep.subr.mxu1 %v423_v47  ;;  %v499_v44 = vld [vmem:[#allocation8 + $0x6d8] sm:$0xff]  ;;  %v498_v46 = vld [vmem:[#allocation8 + $0x6d0] sm:$0xff] }
 0x128   :  { %725 = vmatpush1.msra.mxu0 %v294_v48  ;;  %796 = vmatpush1.msra.mxu1 %v422_v51  ;;  %v367_v47 = vld [vmem:[#allocation8 + $0x2b8] sm:$0xff]  ;;  %v366_v51 = vld [vmem:[#allocation8 + $0x2b0] sm:$0xff] }
 0x129   :  { %726 = vmatprep.subr.mxu0 %v291_v52  ;;  %797 = vmatprep.subr.mxu1 %v419_v53  ;;  %v495_v48 = vld [vmem:[#allocation8 + $0x6b8] sm:$0xff]  ;;  %v494_v52 = vld [vmem:[#allocation8 + $0x6b0] sm:$0xff] }
 0x12a   :  { %727 = vmatpush1.msra.mxu0 %v290_v54  ;;  %798 = vmatpush1.msra.mxu1 %v418_v56  ;;  %v363_v53 = vld [vmem:[#allocation8 + $0x298] sm:$0xff]  ;;  %v362_v56 = vld [vmem:[#allocation8 + $0x290] sm:$0xff] }
 0x12b   :  { %728 = vmatprep.subr.mxu0 %v287_v57  ;;  %799 = vmatprep.subr.mxu1 %v415_v59  ;;  %v491_v54 = vld [vmem:[#allocation8 + $0x698] sm:$0xff]  ;;  %v490_v57 = vld [vmem:[#allocation8 + $0x690] sm:$0xff] }
 0x12c   :  { %729 = vmatpush1.msra.mxu0 %v286_v60  ;;  %800 = vmatpush1.msra.mxu1 %v414_v61  ;;  %v359_v59 = vld [vmem:[#allocation8 + $0x278] sm:$0xff]  ;;  %v358_v61 = vld [vmem:[#allocation8 + $0x270] sm:$0xff] }
 0x12d   :  { %730 = vmatprep.subr.mxu0 %v283_v62  ;;  %801 = vmatprep.subr.mxu1 %v411_v63  ;;  %v487_v60 = vld [vmem:[#allocation8 + $0x678] sm:$0xff]  ;;  %v486_v62 = vld [vmem:[#allocation8 + $0x670] sm:$0xff] }
 0x12e   :  { %731 = vmatpush1.msra.mxu0 %v282_v0  ;;  %802 = vmatpush1.msra.mxu1 %v410_v1  ;;  %v355_v63 = vld [vmem:[#allocation8 + $0x258] sm:$0xff]  ;;  %v354_v1 = vld [vmem:[#allocation8 + $0x250] sm:$0xff] }
 0x12f   :  { %732 = vmatprep.subr.mxu0 %v407_v2  ;;  %803 = vmatprep.subr.mxu1 %v535_v3  ;;  %v483_v0 = vld [vmem:[#allocation8 + $0x658] sm:$0xff]  ;;  %v482_v2 = vld [vmem:[#allocation8 + $0x650] sm:$0xff] }
 0x130   :  { %733 = vmatpush2.msra.mxu0 %v406_v4  ;;  %804 = vmatpush2.msra.mxu1 %v534_v5  ;;  %v351_v3 = vld [vmem:[#allocation8 + $0x238] sm:$0xff]  ;;  %v350_v5 = vld [vmem:[#allocation8 + $0x230] sm:$0xff] }
 0x131   :  { %734 = vmatprep.subr.mxu0 %v403_v6  ;;  %805 = vmatprep.subr.mxu1 %v531_v7  ;;  %v479_v4 = vld [vmem:[#allocation8 + $0x638] sm:$0xff]  ;;  %v478_v6 = vld [vmem:[#allocation8 + $0x630] sm:$0xff] }
 0x132   :  { %735 = vmatpush2.msra.mxu0 %v402_v8  ;;  %806 = vmatpush2.msra.mxu1 %v530_v9  ;;  %v347_v7 = vld [vmem:[#allocation8 + $0x218] sm:$0xff]  ;;  %v346_v9 = vld [vmem:[#allocation8 + $0x210] sm:$0xff] }
 0x133   :  { %736 = vmatprep.subr.mxu0 %v399_v10  ;;  %807 = vmatprep.subr.mxu1 %v527_v11  ;;  %v475_v8 = vld [vmem:[#allocation8 + $0x618] sm:$0xff]  ;;  %v474_v10 = vld [vmem:[#allocation8 + $0x610] sm:$0xff] }
 0x134   :  { %737 = vmatpush2.msra.mxu0 %v398_v12  ;;  %808 = vmatpush2.msra.mxu1 %v526_v13  ;;  %v536_v12 = vld [vmem:[%s1183_s4] sm:$0xf]  ;;  %s1072_s4 = smov 64  }
 0x135   :  { %738 = vmatprep.subr.mxu0 %v395_v14  ;;  %809 = vmatprep.subr.mxu1 %v523_v15  ;;  %v545_v13 = vrot.slane %v536_v12, %v116_v41  ;;  %v541_v15 = vrot.slane %v536_v12, %v112_v39  ;;  %v549_v49 = vrot.slane %v536_v12, %v120_v38 }
 0x136   :  { %739 = vmatpush2.msra.mxu0 %v394_v16  ;;  %810 = vmatpush2.msra.mxu1 %v522_v17 }
 0x137   :  { %740 = vmatprep.subr.mxu0 %v391_v18  ;;  %811 = vmatprep.subr.mxu1 %v519_v19  ;;  %v553_v19 = vrot.slane %v536_v12, %v124_v42 }
 0x138   :  { %741 = vmatpush2.msra.mxu0 %v390_v20  ;;  %812 = vmatpush2.msra.mxu1 %v518_v21 }
 0x139   :  { %742 = vmatprep.subr.mxu0 %v387_v22  ;;  %813 = vmatprep.subr.mxu1 %v515_v23 }
 0x13a   :  { %743 = vmatpush2.msra.mxu0 %v386_v24  ;;  %814 = vmatpush2.msra.mxu1 %v514_v25 }
 0x13b   :  { %744 = vmatprep.subr.mxu0 %v383_v26  ;;  %815 = vmatprep.subr.mxu1 %v511_v27 }
 0x13c   :  { %745 = vmatpush2.msra.mxu0 %v382_v28  ;;  %816 = vmatpush2.msra.mxu1 %v510_v29 }
 0x13d   :  { %746 = vmatprep.subr.mxu0 %v379_v30  ;;  %817 = vmatprep.subr.mxu1 %v507_v31 }
 0x13e   :  { %747 = vmatpush2.msra.mxu0 %v378_v32  ;;  %818 = vmatpush2.msra.mxu1 %v506_v33 }
 0x13f   :  { %748 = vmatprep.subr.mxu0 %v375_v34  ;;  %819 = vmatprep.subr.mxu1 %v503_v35 }
 0x140   :  { %749 = vmatpush2.msra.mxu0 %v374_v36  ;;  %820 = vmatpush2.msra.mxu1 %v502_v40 }
 0x141   :  { %750 = vmatprep.subr.mxu0 %v371_v43  ;;  %821 = vmatprep.subr.mxu1 %v499_v44 }
 0x142   :  { %751 = vmatpush2.msra.mxu0 %v370_v45  ;;  %822 = vmatpush2.msra.mxu1 %v498_v46 }
 0x143   :  { %752 = vmatprep.subr.mxu0 %v367_v47  ;;  %823 = vmatprep.subr.mxu1 %v495_v48 }
 0x144   :  { %753 = vmatpush2.msra.mxu0 %v366_v51  ;;  %824 = vmatpush2.msra.mxu1 %v494_v52 }
 0x145   :  { %754 = vmatprep.subr.mxu0 %v363_v53  ;;  %825 = vmatprep.subr.mxu1 %v491_v54 }
 0x146   :  { %755 = vmatpush2.msra.mxu0 %v362_v56  ;;  %826 = vmatpush2.msra.mxu1 %v490_v57 }
 0x147   :  { %756 = vmatprep.subr.mxu0 %v359_v59  ;;  %827 = vmatprep.subr.mxu1 %v487_v60 }
 0x148   :  { %757 = vmatpush2.msra.mxu0 %v358_v61  ;;  %828 = vmatpush2.msra.mxu1 %v486_v62 }
 0x149   :  { %758 = vmatprep.subr.mxu0 %v355_v63  ;;  %829 = vmatprep.subr.mxu1 %v483_v0 }
 0x14a   :  { %759 = vmatpush2.msra.mxu0 %v354_v1  ;;  %830 = vmatpush2.msra.mxu1 %v482_v2 }
 0x14b   :  { %760 = vmatprep.subr.mxu0 %v351_v3  ;;  %831 = vmatprep.subr.mxu1 %v479_v4 }
 0x14c   :  { %761 = vmatpush2.msra.mxu0 %v350_v5  ;;  %832 = vmatpush2.msra.mxu1 %v478_v6 }
 0x14d   :  { %762 = vmatprep.subr.mxu0 %v347_v7  ;;  %833 = vmatprep.subr.mxu1 %v475_v8 }
 0x14e   :  { %763 = vmatpush2.msra.mxu0 %v346_v9  ;;  %834 = vmatpush2.msra.mxu1 %v474_v10 }
 0x14f   :  { %765 = vmatmul.mubr.f32.vlgmr.msra.gmra.mxu0 %v276_v58  ;;  %836 = vmatmul.mubr.f32.vlgmr.msra.gmra.mxu1 %v278_v55 }
 0x1ce   :  { %v624_v11 = vpop.f32.mrf.mxu0  ;;  %v695_v16 = vpop.f32.mrf.mxu1 }
 0x1cf   :  { %v625_v18 = vadd.f32 %v624_v11, %v541_v15 }
 0x1d0   :  { %v626_v14 = vpop.f32.mrf.mxu0  ;;  %v697_v50 = vpop.f32.mrf.mxu1 }
 0x1d1   :  { %v627_v17 = vadd.f32 %v626_v14, %v545_v13  ;;  %v696_v55 = vadd.f32 %v695_v16, %v625_v18 }
 0x1d3   :  { %v698_v58 = vadd.f32 %v697_v50, %v627_v17  ;;  %v842_v24 = vmax.f32 %v696_v55, 0.0 }
 0x1d5   :  { %v843_v22 = vmax.f32 %v698_v58, 0.0 }
 0x1d7   :  { %v846_v27 = vmax.f32 %v842_v24, %v843_v22 }
 0x20f   :  { %v766_v20 = vpop.f32.mrf.mxu0  ;;  %v837_v21 = vpop.f32.mrf.mxu1 }
 0x210   :  { %v767_v41 = vadd.f32 %v766_v20, %v549_v49 }
 0x211   :  { %v768_v23 = vpop.f32.mrf.mxu0  ;;  %v839_v26 = vpop.f32.mrf.mxu1 }
 0x212   :  { %v838_v25 = vadd.f32 %v837_v21, %v767_v41  ;;  %v769_v39 = vadd.f32 %v768_v23, %v553_v19 }
 0x214   :  { %v844_v28 = vmax.f32 %v838_v25, 0.0  ;;  %v840_v29 = vadd.f32 %v839_v26, %v769_v39 }
 0x216   :  { %v847_v30 = vmax.f32 %v846_v27, %v844_v28  ;;  %v845_v31 = vmax.f32 %v840_v29, 0.0 }
 0x218   :  { %v848_v32 = vmax.f32 %v847_v30, %v845_v31 }
 0x21a   :  { %849 = vst [vmem:[#allocation11] sm:$0x3] %v848_v32  ;;  %851 = vrot.lane.b32.xlu0 %v848_v32, %s1072_s4 }
 0x28c   :  { %v852_v37 = vpop.permute.xlu0 %851 }
 0x28d   :  { %v854_v38 = vmax.f32 %v848_v32, %v852_v37 }
 0x28f   :  { %856 = vrot.lane.b32.xlu0 %v854_v38, %s1073_s17 }
 0x301   :  { %v857_v42 = vpop.permute.xlu0 %856 }
 0x302   :  { %v859_v33 = vmax.f32 %v854_v38, %v857_v42 }
 0x304   :  { %861 = vrot.lane.b32.xlu1 %v859_v33, %s1074_s18 }
 0x376   :  { %v862_v34 = vpop.permute.xlu1 %861 }
 0x377   :  { %v864_v35 = vmax.f32 %v859_v33, %v862_v34 }
 0x379   :  { %866 = vrot.lane.b32.xlu1 %v864_v35, %s1075_s19 }
 0x3eb   :  { %v867_v36 = vpop.permute.xlu1 %866 }
 0x3ec   :  { %v869_v40 = vmax.f32 %v864_v35, %v867_v36 }
 0x3ee   :  { %v871_v43 = vsel %vm870_vm1, %v869_v40, -inf }
 0x3ef   :  { %872 = vmax.xlane.f32.xlu0 %v871_v43 }
 0x478   :  { %v873_v44 = vpop.xlane.xlu0 %872 }
 0x479   :  { %v874_v45 = vsub.f32 %v869_v40, %v873_v44 }
 0x47b   :  { %v875_v46 = vmul.f32 1.442695, %v874_v45 }
 0x47d   :  { %931 = vpow2.f32 %v875_v46 }
 0x48a   :  { %v932_v47 = vpop.eup %931 }
 0x48b   :  { %v877_v48 = vsel %vm870_vm1, %v932_v47, 0.0 }
 0x48c   :  { %878 = vadd.xlane.f32.xlu1 %v877_v48 }
 0x48d   :  { %1026 = shalt.err (!%p1023_p10)
}
 0x48e   :  { %904 = dma.vmem_to_hbm [thread:$0]  %s902_s21, 32, %s1185_s6, [#allocation12]  }
 0x48f   :  { %s1077_s25 = smov [#allocation10]  }
 0x490   :  { %s891_s26 = sshll.u32 %s1077_s25, 4  ;;  %s892_s26 = int_to_ptr.vmem [resolvable:$true] %s891_s26 }
 0x491   :  { %s1035_s27 = scalar_lea.vmem %s892_s26, 32  ;;  %p1040_p12 = scmp.lt.s32.totalorder %s892_s26, %s892_s26 }
 0x492   :  { %p1036_p11 = scmp.ne.s32.totalorder %s892_s26, %s1035_s27  ;;  %p1041_p13 = scmp.lt.s32.totalorder %s1035_s27, %s1035_s27 }
 0x494   :  { %p1042_p0 = por %p1041_p13, %p1040_p12 }
 0x496   :  { %p1043_p1 = pnand %p1042_p0, %p1036_p11 }
 0x515   :  { %v879_v51 = vpop.xlane.xlu1 %878 }
 0x516   :  { %933 = vlog2.f32 %v879_v51 }
 0x523   :  { %v934_v52 = vpop.eup %933 }
 0x524   :  { %v881_v53 = vmul.f32 0.6931472, %v934_v52 }
 0x526   :  { %v882_v54 = vadd.f32 %v881_v53, %v873_v44 }
 0x528   :  { %v883_v56 = vsub.f32 %v869_v40, %v882_v54 }
 0x52a   :  { %884 = vst.msk [vmem:[#allocation10] sm:$0x3] %vm870_vm1, %v883_v56 }
 0x52b   :  { %1046 = shalt.err (!%p1043_p1)
}
 0x52c   :  { %894 = dma.vmem_to_hbm [thread:$0]  %s892_s26, 32, %s1184_s5, [#allocation4]  }
 0x52d   :  { %1061 = dma.done.wait [#allocation4], 32  }
 0x52e   :  { %1062 = vsyncadd [#allocation4], 4294967264 }
 0x52f   :  { %1063 = dma.done.wait [#allocation12], 32  }
 0x530   :  { %1064 = vsyncadd [#allocation12], 4294967264 }
 0x531   :  { %911 = vsyncpa [#allocation3], 1 }
 0x532   :  { %912 = vsyncpa [#allocation6], 1 }
 0x533   :  { %913 = vsyncpa [#allocation9], 1 }
 0x534   :  { %914 = vsyncpa [#allocation4], 1 }
 0x535   :  { %915 = vsyncpa [#allocation12], 1 }

</bundles_post_ra>
